<compile_context>
chip_gen: v7x
topology: tpu7x:2x2x1
jax: 0.10.0
libtpu: 0.0.40
codegen_flags: <defaults>
</compile_context>

<pallas_src>
import functools

import jax
import jax.numpy as jnp
from jax import lax
from jax.experimental import pallas as pl
from jax.experimental.pallas import tpu as pltpu


def _pick_images_per_step(N, L, Cin, Cout, itemsize):
    """Largest NB with N % NB == 0, grid length >= min(2, N), NB*L <= 2048, VMEM-safe."""
    min_grid = min(2, N)
    best = 1
    for nb in range(1, N + 1):
        if N % nb != 0:
            continue
        if N // nb < min_grid:
            continue
        NL = nb * L
        if NL > 2048:
            continue
        vmem = (2 * 2 * (Cin + Cout) * NL * 4          # double-buffered in/out blocks (f32)
                + 9 * (Cin + Cout) * NL * itemsize     # two register im2col values
                + 2 * Cout * NL * 4)                   # h + out (f32)
        if vmem > 24 * 1024 * 1024:
            continue
        best = nb
    return best


def _make_kernel(H, W, C, NL, mxu_dtype):
    TAPS = [(dh, dw) for dh in (-1, 0, 1) for dw in (-1, 0, 1)]  # t = (dh+1)*3 + (dw+1)

    def build_col(act, mask_b):
        # act   : (C, NL) f32 — batched flattened activations (lane = NB*H*W)
        # mask_b: list of 9 (C, NL) f32 per-tap validity masks (broadcast hoisted)
        # returns the K-packed im2col matrix (9*C, NL) in mxu_dtype, kept in registers.
        blocks = []
        for t, (dh, dw) in enumerate(TAPS):
            off = dh * W + dw
            if off == 0:
                blk = act                                    # center tap: mask all-ones
            else:
                # rolled[:, p] = act[:, (p + off) % NL]; wrapped / cross-row / cross-image
                # lanes are exactly the out-of-image taps, which the mask zeroes (== padding).
                rolled = pltpu.roll(act, shift=(-off) % NL, axis=1)
                blk = mask_b[t] * rolled                     # f32 VPU multiply (safe on v5e)
            blocks.append(blk)
        return jnp.concatenate(blocks, axis=0).astype(mxu_dtype)   # (9*C, NL)

    def kernel(x_ref, w1_ref, b1_ref, w2_ref, b2_ref, mask_ref, o_ref):
        # x_ref   : (1, C, NL)  f32
        # w1_ref  : (C, 9*C)    mxu_dtype, column = (kh*3+kw)*C + ci
        # b1_ref  : (C, 1)      f32
        # w2_ref  : (C, 9*C)    mxu_dtype
        # b2_ref  : (C, 1)      f32
        # mask_ref: (9, NL)     f32
        # o_ref   : (1, C, NL)  f32
        xf = x_ref[0]                                        # (C, NL)
        mask = mask_ref[...]                                 # (9, NL)
        # Hoist the 9 sublane broadcasts once; reused by both convs (JAX won't CSE them).
        mask_b = [jnp.broadcast_to(mask[t:t + 1, :], (C, NL)) for t in range(9)]

        # ---- conv1: one im2col matmul + bias + ReLU (f32 epilogue) ----
        col = build_col(xf, mask_b)
        h = jnp.dot(w1_ref[...], col, preferred_element_type=jnp.float32)
        h = jnp.maximum(h + b1_ref[...], 0.0)                # (C, NL) f32

        # ---- conv2: one im2col matmul + bias + residual + ReLU ----
        col = build_col(h, mask_b)
        out = jnp.dot(w2_ref[...], col, preferred_element_type=jnp.float32)
        out = jnp.maximum(out + b2_ref[...] + xf, 0.0)       # lane-dense residual add

        o_ref[0] = out.astype(o_ref.dtype)

    return kernel


@functools.partial(jax.jit, static_argnames=("mxu_dtype",))
def residual_block_forward(x_nchw, w1, b1, w2, b2, *, mxu_dtype=jnp.bfloat16):
    """ResidualBlock(in_ch, out_ch, stride=1, downsample=None, norm=None).forward.

    x_nchw : (N, Cin, H, W)     -- PyTorch layout (kept)
    w1     : (3, 3, Cin, Cout)  HWIO
    b1     : (Cout,)
    w2     : (3, 3, Cout, Cout) HWIO
    b2     : (Cout,)
    returns (N, Cout, H, W) float32
    """
    N, Cin, H, W = x_nchw.shape
    Cout = w1.shape[-1]
    assert Cin == Cout, "no-downsample residual requires in_channels == out_channels"
    C = Cin
    L = H * W

    itemsize = jnp.dtype(mxu_dtype).itemsize
    NB = _pick_images_per_step(N, L, Cin, Cout, itemsize)    # images packed per grid step
    G = N // NB
    NL = NB * L

    # Layout plumbing in the wrapper: (N,C,H,W) -> (G, C, NB*L), lane-dense per grid step.
    xg = x_nchw.astype(jnp.float32).reshape(G, NB, C, L)
    xg = jnp.transpose(xg, (0, 2, 1, 3)).reshape(G, C, NL)   # no-op relayout when NB == 1

    # Flatten weights to 2-D (Cout, 9*Cin); column index = (kh*3+kw)*Cin + ci.
    w1m = jnp.transpose(w1.reshape(9 * C, C)).astype(mxu_dtype)
    w2m = jnp.transpose(w2.reshape(9 * C, C)).astype(mxu_dtype)
    b1c = b1.reshape(C, 1).astype(jnp.float32)
    b2c = b2.reshape(C, 1).astype(jnp.float32)

    # Per-tap validity masks (implements zero padding), tiled across the NB packed images.
    h_idx = jnp.arange(L, dtype=jnp.int32) // W
    w_idx = jnp.arange(L, dtype=jnp.int32) % W
    masks = []
    for dh in (-1, 0, 1):
        for dw in (-1, 0, 1):
            valid = ((h_idx + dh >= 0) & (h_idx + dh < H) &
                     (w_idx + dw >= 0) & (w_idx + dw < W))
            masks.append(valid)
    mask = jnp.tile(jnp.stack(masks).astype(jnp.float32), (1, NB))   # (9, NL)

    kernel = _make_kernel(H, W, C, NL, mxu_dtype)

    cost = pl.CostEstimate(
        flops=N * 2 * (2 * 9 * L * C * C),                   # two 3x3 convs
        transcendentals=0,
        bytes_accessed=int((xg.size + G * C * NL) * 4
                           + (w1m.size + w2m.size) * itemsize
                           + mask.size * 4 + 2 * C * 4),
    )

    out = pl.pallas_call(
        kernel,
        out_shape=jax.ShapeDtypeStruct((G, C, NL), jnp.float32),
        grid_spec=pltpu.PrefetchScalarGridSpec(
            num_scalar_prefetch=0,
            grid=(G,),
            in_specs=[
                pl.BlockSpec((1, C, NL), lambda n: (n, 0, 0)),
                pl.BlockSpec((C, 9 * C), lambda n: (0, 0)),
                pl.BlockSpec((C, 1), lambda n: (0, 0)),
                pl.BlockSpec((C, 9 * C), lambda n: (0, 0)),
                pl.BlockSpec((C, 1), lambda n: (0, 0)),
                pl.BlockSpec((9, NL), lambda n: (0, 0)),
            ],
            out_specs=pl.BlockSpec((1, C, NL), lambda n: (n, 0, 0)),
        ),
        compiler_params=pltpu.CompilerParams(
            dimension_semantics=("parallel",),
            vmem_limit_bytes=32 * 1024 * 1024,
        ),
        cost_estimate=cost,
    )(xg, w1m, b1c, w2m, b2c, mask)

    # Undo the layout plumbing: (G, C, NB*L) -> (N, C, H, W).
    out = out.reshape(G, C, NB, L)
    out = jnp.transpose(out, (0, 2, 1, 3)).reshape(N, C, H, W)
    return out


def _reference_forward(x_nchw, w1, b1, w2, b2):
    """Pure-JAX reference (lax.conv) mirroring the PyTorch forward."""
    x = jnp.transpose(x_nchw, (0, 2, 3, 1)).astype(jnp.float32)
    dn = lax.conv_dimension_numbers(x.shape, w1.shape, ("NHWC", "HWIO", "NHWC"))
    out = lax.conv_general_dilated(x, w1, (1, 1), ((1, 1), (1, 1)),
                                   dimension_numbers=dn) + b1
    out = jnp.maximum(out, 0.0)
    out = lax.conv_general_dilated(out, w2, (1, 1), ((1, 1), (1, 1)),
                                   dimension_numbers=dn) + b2
    out = jnp.maximum(out + x, 0.0)
    return jnp.transpose(out, (0, 3, 1, 2))


if __name__ == "__main__":
    # Small deterministic setup: batch=2, channels=4, spatial 16x16.
    N, C, H, W = 2, 4, 16, 16
    key = jax.random.PRNGKey(0)
    kx, k1, kb1, k2, kb2 = jax.random.split(key, 5)

    x = jax.random.normal(kx, (N, C, H, W), dtype=jnp.float32)
    # Deterministic init matching nn.Conv2d(C, C, 3, padding=1, bias=True), stored in HWIO.
    fan_in = C * 3 * 3
    bound = 1.0 / (fan_in ** 0.5)
    w1 = jax.random.uniform(k1, (3, 3, C, C), jnp.float32, -bound, bound)
    b1 = jax.random.uniform(kb1, (C,), jnp.float32, -bound, bound)
    w2 = jax.random.uniform(k2, (3, 3, C, C), jnp.float32, -bound, bound)
    b2 = jax.random.uniform(kb2, (C,), jnp.float32, -bound, bound)

    ref = _reference_forward(x, w1, b1, w2, b2)

    # f32 MXU path (exact check).
    out_f32 = jax.block_until_ready(
        residual_block_forward(x, w1, b1, w2, b2, mxu_dtype=jnp.float32))
    assert out_f32.shape == (N, C, H, W)
    assert jnp.allclose(out_f32, ref, rtol=1e-4, atol=1e-4), "f32 kernel mismatch vs reference"

    # Default bf16-MXU path (v6e/v7x): bf16 operands, f32 accumulation + f32 epilogue.
    out_bf16 = jax.block_until_ready(residual_block_forward(x, w1, b1, w2, b2))
    assert out_bf16.shape == (N, C, H, W)
    assert jnp.allclose(out_bf16, ref, rtol=1e-1, atol=1e-1), "bf16 kernel mismatch vs reference"

    print("KERNEL_OK")
</pallas_src>

<mosaic_0001>
module attributes {stable_mosaic.version = 11 : i64} {
  func.func @kernel(%arg0: i32, %arg1: memref<1x4x256xf32, #tpu.memory_space<vmem>>, %arg2: memref<4x36xf32, #tpu.memory_space<vmem>>, %arg3: memref<4x1xf32, #tpu.memory_space<vmem>>, %arg4: memref<4x36xf32, #tpu.memory_space<vmem>>, %arg5: memref<4x1xf32, #tpu.memory_space<vmem>>, %arg6: memref<9x256xf32, #tpu.memory_space<vmem>>, %arg7: memref<1x4x256xf32, #tpu.memory_space<vmem>>) attributes {dimension_semantics = [#tpu.dimension_semantics<parallel>], iteration_bounds = array<i64: 2>, scalar_prefetch = 0 : i64, scratch_operands = 0 : i64, tpu.core_type = #tpu.core_type<tc>, window_params = [{transform_indices = @transform_0, window_bounds = array<i64: 1, 4, 256>}, {pipeline_mode = #tpu.pipeline_mode<synchronous>, transform_indices = @transform_1, window_bounds = array<i64: 4, 36>}, {pipeline_mode = #tpu.pipeline_mode<synchronous>, transform_indices = @transform_2, window_bounds = array<i64: 4, 1>}, {pipeline_mode = #tpu.pipeline_mode<synchronous>, transform_indices = @transform_3, window_bounds = array<i64: 4, 36>}, {pipeline_mode = #tpu.pipeline_mode<synchronous>, transform_indices = @transform_4, window_bounds = array<i64: 4, 1>}, {pipeline_mode = #tpu.pipeline_mode<synchronous>, transform_indices = @transform_5, window_bounds = array<i64: 9, 256>}, {transform_indices = @transform_6, window_bounds = array<i64: 1, 4, 256>}]} {
    %c0 = arith.constant 0 : index
    %c0_0 = arith.constant 0 : index
    %c0_1 = arith.constant 0 : index
    %0 = vector.load %arg1[%c0, %c0_0, %c0_1] : memref<1x4x256xf32, #tpu.memory_space<vmem>>, vector<1x4x256xf32>
    %1 = vector.shape_cast %0 : vector<1x4x256xf32> to vector<4x256xf32>
    %c0_2 = arith.constant 0 : index
    %c0_3 = arith.constant 0 : index
    %2 = vector.load %arg6[%c0_2, %c0_3] : memref<9x256xf32, #tpu.memory_space<vmem>>, vector<9x256xf32>
    %3 = vector.extract_strided_slice %2 {offsets = [0, 0], sizes = [1, 256], strides = [1, 1]} : vector<9x256xf32> to vector<1x256xf32>
    %4 = vector.shape_cast %3 : vector<1x256xf32> to vector<1x256xf32>
    %5 = vector.broadcast %4 : vector<1x256xf32> to vector<4x256xf32>
    %6 = vector.extract_strided_slice %2 {offsets = [1, 0], sizes = [1, 256], strides = [1, 1]} : vector<9x256xf32> to vector<1x256xf32>
    %7 = vector.shape_cast %6 : vector<1x256xf32> to vector<1x256xf32>
    %8 = vector.broadcast %7 : vector<1x256xf32> to vector<4x256xf32>
    %9 = vector.extract_strided_slice %2 {offsets = [2, 0], sizes = [1, 256], strides = [1, 1]} : vector<9x256xf32> to vector<1x256xf32>
    %10 = vector.shape_cast %9 : vector<1x256xf32> to vector<1x256xf32>
    %11 = vector.broadcast %10 : vector<1x256xf32> to vector<4x256xf32>
    %12 = vector.extract_strided_slice %2 {offsets = [3, 0], sizes = [1, 256], strides = [1, 1]} : vector<9x256xf32> to vector<1x256xf32>
    %13 = vector.shape_cast %12 : vector<1x256xf32> to vector<1x256xf32>
    %14 = vector.broadcast %13 : vector<1x256xf32> to vector<4x256xf32>
    %15 = vector.extract_strided_slice %2 {offsets = [5, 0], sizes = [1, 256], strides = [1, 1]} : vector<9x256xf32> to vector<1x256xf32>
    %16 = vector.shape_cast %15 : vector<1x256xf32> to vector<1x256xf32>
    %17 = vector.broadcast %16 : vector<1x256xf32> to vector<4x256xf32>
    %18 = vector.extract_strided_slice %2 {offsets = [6, 0], sizes = [1, 256], strides = [1, 1]} : vector<9x256xf32> to vector<1x256xf32>
    %19 = vector.shape_cast %18 : vector<1x256xf32> to vector<1x256xf32>
    %20 = vector.broadcast %19 : vector<1x256xf32> to vector<4x256xf32>
    %21 = vector.extract_strided_slice %2 {offsets = [7, 0], sizes = [1, 256], strides = [1, 1]} : vector<9x256xf32> to vector<1x256xf32>
    %22 = vector.shape_cast %21 : vector<1x256xf32> to vector<1x256xf32>
    %23 = vector.broadcast %22 : vector<1x256xf32> to vector<4x256xf32>
    %24 = vector.extract_strided_slice %2 {offsets = [8, 0], sizes = [1, 256], strides = [1, 1]} : vector<9x256xf32> to vector<1x256xf32>
    %25 = vector.shape_cast %24 : vector<1x256xf32> to vector<1x256xf32>
    %26 = vector.broadcast %25 : vector<1x256xf32> to vector<4x256xf32>
    %c17_i32 = arith.constant 17 : i32
    %27 = tpu.dynamic_rotate %1 by %c17_i32 dim 1 : vector<4x256xf32>, i32 -> vector<4x256xf32>
    %28 = arith.mulf %5, %27 : vector<4x256xf32>
    %c16_i32 = arith.constant 16 : i32
    %29 = tpu.dynamic_rotate %1 by %c16_i32 dim 1 : vector<4x256xf32>, i32 -> vector<4x256xf32>
    %30 = arith.mulf %8, %29 : vector<4x256xf32>
    %c15_i32 = arith.constant 15 : i32
    %31 = tpu.dynamic_rotate %1 by %c15_i32 dim 1 : vector<4x256xf32>, i32 -> vector<4x256xf32>
    %32 = arith.mulf %11, %31 : vector<4x256xf32>
    %c1_i32 = arith.constant 1 : i32
    %33 = tpu.dynamic_rotate %1 by %c1_i32 dim 1 : vector<4x256xf32>, i32 -> vector<4x256xf32>
    %34 = arith.mulf %14, %33 : vector<4x256xf32>
    %c255_i32 = arith.constant 255 : i32
    %35 = tpu.dynamic_rotate %1 by %c255_i32 dim 1 : vector<4x256xf32>, i32 -> vector<4x256xf32>
    %36 = arith.mulf %17, %35 : vector<4x256xf32>
    %c241_i32 = arith.constant 241 : i32
    %37 = tpu.dynamic_rotate %1 by %c241_i32 dim 1 : vector<4x256xf32>, i32 -> vector<4x256xf32>
    %38 = arith.mulf %20, %37 : vector<4x256xf32>
    %c240_i32 = arith.constant 240 : i32
    %39 = tpu.dynamic_rotate %1 by %c240_i32 dim 1 : vector<4x256xf32>, i32 -> vector<4x256xf32>
    %40 = arith.mulf %23, %39 : vector<4x256xf32>
    %c239_i32 = arith.constant 239 : i32
    %41 = tpu.dynamic_rotate %1 by %c239_i32 dim 1 : vector<4x256xf32>, i32 -> vector<4x256xf32>
    %42 = arith.mulf %26, %41 : vector<4x256xf32>
    %43 = tpu.concatenate %28, %30, %32, %34, %1, %36, %38, %40, %42 in 0 : vector<4x256xf32>, vector<4x256xf32>, vector<4x256xf32>, vector<4x256xf32>, vector<4x256xf32>, vector<4x256xf32>, vector<4x256xf32>, vector<4x256xf32>, vector<4x256xf32> -> vector<36x256xf32>
    %c0_4 = arith.constant 0 : index
    %c0_5 = arith.constant 0 : index
    %44 = vector.load %arg2[%c0_4, %c0_5] : memref<4x36xf32, #tpu.memory_space<vmem>>, vector<4x36xf32>
    %cst = arith.constant dense<0.000000e+00> : vector<4x256xf32>
    %45 = tpu.matmul %44, %43, %cst {dimension_numbers = #tpu.dot_dimension_numbers<[1], [0], [0], [1], [0, 0, 1, 1], [], []>} : vector<4x36xf32>, vector<36x256xf32>, vector<4x256xf32> -> vector<4x256xf32>
    %c0_6 = arith.constant 0 : index
    %c0_7 = arith.constant 0 : index
    %46 = vector.load %arg3[%c0_6, %c0_7] : memref<4x1xf32, #tpu.memory_space<vmem>>, vector<4x1xf32>
    %47 = vector.broadcast %46 : vector<4x1xf32> to vector<4x256xf32>
    %48 = arith.addf %45, %47 : vector<4x256xf32>
    %cst_8 = arith.constant 0.000000e+00 : f32
    %49 = vector.broadcast %cst_8 : f32 to vector<4x256xf32>
    %50 = arith.maximumf %48, %49 : vector<4x256xf32>
    %c17_i32_9 = arith.constant 17 : i32
    %51 = tpu.dynamic_rotate %50 by %c17_i32_9 dim 1 : vector<4x256xf32>, i32 -> vector<4x256xf32>
    %52 = arith.mulf %5, %51 : vector<4x256xf32>
    %c16_i32_10 = arith.constant 16 : i32
    %53 = tpu.dynamic_rotate %50 by %c16_i32_10 dim 1 : vector<4x256xf32>, i32 -> vector<4x256xf32>
    %54 = arith.mulf %8, %53 : vector<4x256xf32>
    %c15_i32_11 = arith.constant 15 : i32
    %55 = tpu.dynamic_rotate %50 by %c15_i32_11 dim 1 : vector<4x256xf32>, i32 -> vector<4x256xf32>
    %56 = arith.mulf %11, %55 : vector<4x256xf32>
    %c1_i32_12 = arith.constant 1 : i32
    %57 = tpu.dynamic_rotate %50 by %c1_i32_12 dim 1 : vector<4x256xf32>, i32 -> vector<4x256xf32>
    %58 = arith.mulf %14, %57 : vector<4x256xf32>
    %c255_i32_13 = arith.constant 255 : i32
    %59 = tpu.dynamic_rotate %50 by %c255_i32_13 dim 1 : vector<4x256xf32>, i32 -> vector<4x256xf32>
    %60 = arith.mulf %17, %59 : vector<4x256xf32>
    %c241_i32_14 = arith.constant 241 : i32
    %61 = tpu.dynamic_rotate %50 by %c241_i32_14 dim 1 : vector<4x256xf32>, i32 -> vector<4x256xf32>
    %62 = arith.mulf %20, %61 : vector<4x256xf32>
    %c240_i32_15 = arith.constant 240 : i32
    %63 = tpu.dynamic_rotate %50 by %c240_i32_15 dim 1 : vector<4x256xf32>, i32 -> vector<4x256xf32>
    %64 = arith.mulf %23, %63 : vector<4x256xf32>
    %c239_i32_16 = arith.constant 239 : i32
    %65 = tpu.dynamic_rotate %50 by %c239_i32_16 dim 1 : vector<4x256xf32>, i32 -> vector<4x256xf32>
    %66 = arith.mulf %26, %65 : vector<4x256xf32>
    %67 = tpu.concatenate %52, %54, %56, %58, %50, %60, %62, %64, %66 in 0 : vector<4x256xf32>, vector<4x256xf32>, vector<4x256xf32>, vector<4x256xf32>, vector<4x256xf32>, vector<4x256xf32>, vector<4x256xf32>, vector<4x256xf32>, vector<4x256xf32> -> vector<36x256xf32>
    %c0_17 = arith.constant 0 : index
    %c0_18 = arith.constant 0 : index
    %68 = vector.load %arg4[%c0_17, %c0_18] : memref<4x36xf32, #tpu.memory_space<vmem>>, vector<4x36xf32>
    %cst_19 = arith.constant dense<0.000000e+00> : vector<4x256xf32>
    %69 = tpu.matmul %68, %67, %cst_19 {dimension_numbers = #tpu.dot_dimension_numbers<[1], [0], [0], [1], [0, 0, 1, 1], [], []>} : vector<4x36xf32>, vector<36x256xf32>, vector<4x256xf32> -> vector<4x256xf32>
    %c0_20 = arith.constant 0 : index
    %c0_21 = arith.constant 0 : index
    %70 = vector.load %arg5[%c0_20, %c0_21] : memref<4x1xf32, #tpu.memory_space<vmem>>, vector<4x1xf32>
    %71 = vector.broadcast %70 : vector<4x1xf32> to vector<4x256xf32>
    %72 = arith.addf %69, %71 : vector<4x256xf32>
    %73 = arith.addf %72, %1 : vector<4x256xf32>
    %cst_22 = arith.constant 0.000000e+00 : f32
    %74 = vector.broadcast %cst_22 : f32 to vector<4x256xf32>
    %75 = arith.maximumf %73, %74 : vector<4x256xf32>
    %c0_23 = arith.constant 0 : index
    %c0_24 = arith.constant 0 : index
    %c0_25 = arith.constant 0 : index
    %76 = vector.load %arg7[%c0_23, %c0_24, %c0_25] : memref<1x4x256xf32, #tpu.memory_space<vmem>>, vector<1x4x256xf32>
    %77 = vector.shape_cast %76 : vector<1x4x256xf32> to vector<4x256xf32>
    %78 = vector.shape_cast %75 : vector<4x256xf32> to vector<1x4x256xf32>
    tpu.vector_store %arg7[%c0_23, %c0_24, %c0_25], %78 {strides = array<i32>} : memref<1x4x256xf32, #tpu.memory_space<vmem>>, vector<1x4x256xf32>,
    return
  }
  func.func @transform_0(%arg0: i32) -> (i32, i32, i32) {
    %c0_i32 = arith.constant 0 : i32
    %c0_i32_0 = arith.constant 0 : i32
    %c0_i32_1 = arith.constant 0 : i32
    return %arg0, %c0_i32, %c0_i32_0 : i32, i32, i32
  }
  func.func @transform_1(%arg0: i32) -> (i32, i32) {
    %c0_i32 = arith.constant 0 : i32
    %c0_i32_0 = arith.constant 0 : i32
    %c0_i32_1 = arith.constant 0 : i32
    return %c0_i32, %c0_i32_0 : i32, i32
  }
  func.func @transform_2(%arg0: i32) -> (i32, i32) {
    %c0_i32 = arith.constant 0 : i32
    %c0_i32_0 = arith.constant 0 : i32
    %c0_i32_1 = arith.constant 0 : i32
    return %c0_i32, %c0_i32_0 : i32, i32
  }
  func.func @transform_3(%arg0: i32) -> (i32, i32) {
    %c0_i32 = arith.constant 0 : i32
    %c0_i32_0 = arith.constant 0 : i32
    %c0_i32_1 = arith.constant 0 : i32
    return %c0_i32, %c0_i32_0 : i32, i32
  }
  func.func @transform_4(%arg0: i32) -> (i32, i32) {
    %c0_i32 = arith.constant 0 : i32
    %c0_i32_0 = arith.constant 0 : i32
    %c0_i32_1 = arith.constant 0 : i32
    return %c0_i32, %c0_i32_0 : i32, i32
  }
  func.func @transform_5(%arg0: i32) -> (i32, i32) {
    %c0_i32 = arith.constant 0 : i32
    %c0_i32_0 = arith.constant 0 : i32
    %c0_i32_1 = arith.constant 0 : i32
    return %c0_i32, %c0_i32_0 : i32, i32
  }
  func.func @transform_6(%arg0: i32) -> (i32, i32, i32) {
    %c0_i32 = arith.constant 0 : i32
    %c0_i32_0 = arith.constant 0 : i32
    %c0_i32_1 = arith.constant 0 : i32
    return %arg0, %c0_i32, %c0_i32_0 : i32, i32, i32
  }
}

</mosaic_0001>

<bundles_post_ra>
// kernel: residual_block_forward.1
= control target key start
LH: loop header
LB: loop body
LE: loop exit
PB: predicated region body
PF: predicated region fallthrough
CT: control target
= control target key end

     0   :  { %s878_s21 = smov 0   ;;  %s1193_s0 = inlined_call_operand.vmem [shape: f32[2,4,256], index: 0, kind: input, shape index: {}]   ;;  %s1194_s1 = inlined_call_operand.vmem [shape: f32[4,36], index: 1, kind: input, shape index: {}]   ;;  %s1195_s2 = inlined_call_operand.vmem [shape: f32[4,1], index: 2, kind: input, shape index: {}]   ;;  %s1196_s3 = inlined_call_operand.vmem [shape: f32[4,36], index: 3, kind: input, shape index: {}]   ;;  %s1197_s4 = inlined_call_operand.vmem [shape: f32[4,1], index: 4, kind: input, shape index: {}]   ;;  %s1198_s5 = inlined_call_operand.vmem [shape: f32[9,256], index: 5, kind: input, shape index: {}]   ;;  %s1199_s6 = inlined_call_operand.vmem [shape: f32[2,4,256], index: 6, kind: output, shape index: {}]  }
   0x1 LB: > { %s768_s22 = sadd.s32 4294967295, %s831_s21   ;;  %p772_p0 = scmp.ge.s32.totalorder %s831_s21, 1  ;;  %s831_s21 = sphi %s878_s21, %s16_s21  }
   0x2   : > { %p212_p1 = scmp.lt.s32.totalorder %s831_s21, 3 }
   0x4   : > { %p213_p2 = pnand %p772_p0, %p212_p1 }
   0x5   : > { %p242_p3 = scmp.lt.s32.totalorder (!%p213_p2), %s768_s22, 1  ;;  %s833_s27 = smov (!%p213_p2), 1   ;;  %v839_v2 = vmov (!%p213_p2), 0.0   ;;  %v841_v3 = vmov (!%p213_p2), 0   ;;  %v432_v4 = vld [vmem:[%s1195_s2] sm:$0xf] (!%p213_p2)  ;;  %v257_v5 = vlaneseq (!%p213_p2) }
   0x6   : > { %216 = sbr.rel (%p213_p2) target bundleno = 761 (0x2f9), region = 44  ;;  %s834_s28 = smov (!%p213_p2), 16   ;;  %512 = vmatprep.mubr.f32.mxu0 (!%p213_p2), %v839_v2  ;;  %697 = vmatprep.mubr.f32.mxu1 (!%p213_p2), %v839_v2  ;;  %v943_v11 = vld [vmem:[%s1198_s5] sm:$0xff] (!%p213_p2)  ;;  %v948_v12 = vld [vmem:[%s1198_s5 + $0x8] sm:$0xff] (!%p213_p2)  ;;  %vm422_vm4 = vcmask (!%p213_p2), 1043456   ;;  %vm438_vm9 = vcmask (!%p213_p2), 293888  }
   0x7   : > { %s835_s29 = smov (!%p213_p2), 17   ;;  %s836_s30 = smov (!%p213_p2), 15   ;;  %823 = vset.pattern.permute.xlu0 (!%p213_p2), %v841_v3  ;;  %v935_v6 = vshrl.u32 (!%p213_p2), %v257_v5, 7  ;;  %v937_v7 = vand.u32 (!%p213_p2), 127, %v257_v5 }
   0x8   : > { %s837_s7 = smov (!%p213_p2), 127   ;;  %s838_s8 = smov (!%p213_p2), 112  }
   0x9   : > { %s840_s9 = smov (!%p213_p2), 113   ;;  %s842_s10 = smov (!%p213_p2), 111   ;;  %v283_v10 = vsub.s32 (!%p213_p2), 3, %v935_v6  ;;  %v267_v13 = vsub.s32 (!%p213_p2), 1, %v935_v6  ;;  %vm357_vm0 = vcmp.lt.s32.totalorder (!%p213_p2), %v937_v7, 1  ;;  %v259_v16 = vsub.s32 (!%p213_p2), 0, %v935_v6 }
   0xa   : > { %vm339_vm1 = vcmp.lt.s32.totalorder (!%p213_p2), %v937_v7, 16  ;;  %v275_v19 = vsub.s32 (!%p213_p2), 2, %v935_v6  ;;  %vm330_vm2 = vcmp.lt.s32.totalorder (!%p213_p2), %v937_v7, 17  ;;  %vm348_vm3 = vcmp.lt.s32.totalorder (!%p213_p2), %v937_v7, 15 }
   0xb   : > { %v954_v17 = vrot.slane (!%p213_p2), %v943_v11, %v283_v10  ;;  %v957_v18 = vrot.slane (!%p213_p2), %v948_v12, %v283_v10  ;;  %v966_v22 = vrot.slane (!%p213_p2), %v943_v11, %v267_v13  ;;  %v969_v23 = vrot.slane (!%p213_p2), %v948_v12, %v267_v13 }
   0xc   : > { %v972_v24 = vrot.slane (!%p213_p2), %v943_v11, %v259_v16  ;;  %v975_v25 = vrot.slane (!%p213_p2), %v948_v12, %v259_v16  ;;  %v988_v34 = vrot.slane (!%p213_p2), %v943_v11, %v275_v19  ;;  %v991_v35 = vrot.slane (!%p213_p2), %v948_v12, %v275_v19 }
   0xd   : > { %s1201_s22 = smov (!%p242_p3, %s768_s22), 1  ;;  %v291_v38 = vsub.s32 5, %v935_v6  ;;  %vm366_vm5 = vcmp.lt.s32.totalorder %v937_v7, 127  ;;  %v307_v43 = vsub.s32 7, %v935_v6  ;;  %v299_v54 = vsub.s32 6, %v935_v6 }
   0xe   : > { %s787_s23 = sshll.u32 %s1201_s22, 3  ;;  %vm384_vm6 = vcmp.lt.s32.totalorder %v937_v7, 112  ;;  %vm375_vm7 = vcmp.lt.s32.totalorder %v937_v7, 113  ;;  %vm393_vm8 = vcmp.lt.s32.totalorder %v937_v7, 111 }
   0xf   : > { %s246_s26 = scalar_lea.vmem %s1193_s0, %s787_s23  ;;  %v1009_v52 = vrot.slane %v943_v11, %v291_v38  ;;  %v1012_v53 = vrot.slane %v948_v12, %v291_v38  ;;  %v1024_v3 = vrot.slane %v943_v11, %v307_v43  ;;  %v1042_v19 = vrot.slane %v948_v12, %v299_v54 }
  0x10   : > { %v894_v0 = vld [vmem:[%s246_s26] sm:$0xff] }
  0x11   : > { %353 = vrot.lane.b32.xlu1 %v894_v0, %s833_s27  ;;  %335 = vrot.lane.b32.xlu0 %v894_v0, %s834_s28  ;;  %v902_v1 = vcombine.high %v894_v0, %v894_v0 }
  0x15   : > { %324 = vrot.lane.b32.xlu0 %v894_v0, %s835_s29  ;;  %355 = vrot.lane.b32.xlu1 %v902_v1, %s833_s27 }
  0x19   : > { %326 = vrot.lane.b32.xlu1 %v902_v1, %s835_s29  ;;  %337 = vrot.lane.b32.xlu0 %v902_v1, %s834_s28 }
  0x1d   : > { %346 = vrot.lane.b32.xlu1 %v902_v1, %s836_s30  ;;  %344 = vrot.lane.b32.xlu0 %v894_v0, %s836_s30 }
  0x21   : > { %364 = vrot.lane.b32.xlu1 %v902_v1, %s837_s7  ;;  %362 = vrot.lane.b32.xlu0 %v894_v0, %s837_s7 }
  0x25   : > { %382 = vrot.lane.b32.xlu1 %v902_v1, %s838_s8  ;;  %380 = vrot.lane.b32.xlu0 %v894_v0, %s838_s8 }
  0x29   : > { %373 = vrot.lane.b32.xlu1 %v902_v1, %s840_s9  ;;  %371 = vrot.lane.b32.xlu0 %v894_v0, %s840_s9 }
  0x2d   : > { %391 = vrot.lane.b32.xlu1 %v902_v1, %s842_s10  ;;  %389 = vrot.lane.b32.xlu0 %v894_v0, %s842_s10 }
  0x31   : > { %435 = vperm.xlu0 %823, %v432_v4   ;;  %v1027_v4 = vrot.slane %v948_v12, %v307_v43 }
  0x83   : > { %v354_v8 = vpop.permute.xlu1 %353  ;;  %v336_v9 = vpop.permute.xlu0 %335 }
  0x87   : > { %v325_v14 = vpop.permute.xlu0 %324  ;;  %v356_v15 = vpop.permute.xlu1 %355 }
  0x88   : > { %v358_v20 = vsel %vm357_vm0, %v354_v8, %v356_v15  ;;  %v359_v21 = vsel %vm357_vm0, %v356_v15, %v354_v8 }
  0x89   : > { %v360_v28 = vmul.f32 %v359_v21, %v954_v17  ;;  %v361_v29 = vmul.f32 %v358_v20, %v957_v18 }
  0x8b   : > { %v327_v26 = vpop.permute.xlu1 %326  ;;  %v338_v27 = vpop.permute.xlu0 %337  ;;  %v406_v44 = vrot.slane %v360_v28, 4  ;;  %v407_v45 = vrot.slane %v361_v29, 4 }
  0x8c   : > { %v340_v30 = vsel %vm339_vm1, %v336_v9, %v338_v27  ;;  %v341_v31 = vsel %vm339_vm1, %v338_v27, %v336_v9  ;;  %v331_v36 = vsel %vm330_vm2, %v325_v14, %v327_v26  ;;  %v332_v37 = vsel %vm330_vm2, %v327_v26, %v325_v14 }
  0x8d   : > { %v342_v32 = vmul.f32 %v341_v31, %v966_v22  ;;  %v343_v33 = vmul.f32 %v340_v30, %v969_v23  ;;  %v333_v48 = vmul.f32 %v332_v37, %v972_v24  ;;  %v334_v49 = vmul.f32 %v331_v36, %v975_v25 }
  0x8e   : > { %v1037_v14 = vrot.slane %v943_v11, %v299_v54 }
  0x8f   : > { %v400_v39 = vrot.slane %v342_v32, 4  ;;  %v401_v40 = vrot.slane %v343_v33, 4  ;;  %v347_v41 = vpop.permute.xlu1 %346  ;;  %v345_v42 = vpop.permute.xlu0 %344  ;;  %v1055_v32 = vld [vmem:[%s1198_s5 + $0x18] ss:$0 sm:$0xff] }
  0x90   : > { %v349_v46 = vsel %vm348_vm3, %v345_v42, %v347_v41  ;;  %v350_v47 = vsel %vm348_vm3, %v347_v41, %v345_v42  ;;  %v1066_v42 = vld [vmem:[%s1198_s5 + $0x10] ss:$0 sm:$0xff] }
  0x91   : > { %v351_v50 = vmul.f32 %v350_v47, %v988_v34  ;;  %v352_v51 = vmul.f32 %v349_v46, %v991_v35  ;;  %v424_v57 = vsel %vm422_vm4, %v334_v49, %v401_v40  ;;  %v423_v59 = vsel %vm422_vm4, %v333_v48, %v400_v39  ;;  %v431_v48 = vld [vmem:[%s1194_s1] sm:$0xf] }
  0x93   : > { %v365_v55 = vpop.permute.xlu1 %364  ;;  %v363_v56 = vpop.permute.xlu0 %362  ;;  %v426_v58 = vsel %vm422_vm4, %v352_v51, %v407_v45  ;;  %v425_v60 = vsel %vm422_vm4, %v351_v50, %v406_v44 }
  0x94   : > { %v367_v61 = vsel %vm366_vm5, %v363_v56, %v365_v55  ;;  %v368_v62 = vsel %vm366_vm5, %v365_v55, %v363_v56  ;;  %v789_v63 = vpack.c.bf16 %v426_v58, %v424_v57  ;;  %v791_v2 = vpack.c.bf16 %v425_v60, %v423_v59  ;;  %v618_v58 = vld [vmem:[%s1197_s4] sm:$0xf] }
  0x95   : > { %v369_v5 = vmul.f32 %v367_v61, %v1009_v52  ;;  %v370_v6 = vmul.f32 %v368_v62, %v1012_v53 }
  0x96   : > { %790 = vmatprep.subr.bf16.mxu0 %v789_v63 }
  0x97   : > { %v383_v8 = vpop.permute.xlu1 %382  ;;  %792 = vmatpush1.bf16.msra.mxu0 %v791_v2  ;;  %v381_v9 = vpop.permute.xlu0 %380  ;;  %v412_v20 = vrot.slane %v369_v5, 4  ;;  %v413_v21 = vrot.slane %v370_v6, 4 }
  0x98   : > { %v385_v10 = vsel %vm384_vm6, %v381_v9, %v383_v8  ;;  %v386_v13 = vsel %vm384_vm6, %v383_v8, %v381_v9 }
  0x99   : > { %v387_v15 = vmul.f32 %v385_v10, %v1024_v3  ;;  %v388_v16 = vmul.f32 %v386_v13, %v1027_v4  ;;  %v428_v36 = vsel %vm422_vm4, %v902_v1, %v413_v21  ;;  %v427_v39 = vsel %vm422_vm4, %v894_v0, %v412_v20 }
  0x9b   : > { %v374_v26 = vpop.permute.xlu1 %373  ;;  %v372_v27 = vpop.permute.xlu0 %371  ;;  %v418_v29 = vrot.slane %v387_v15, 4  ;;  %v419_v30 = vrot.slane %v388_v16, 4 }
  0x9c   : > { %v376_v28 = vsel %vm375_vm7, %v372_v27, %v374_v26  ;;  %v377_v11 = vsel %vm375_vm7, %v374_v26, %v372_v27 }
  0x9d   : > { %v378_v31 = vmul.f32 %v376_v28, %v1037_v14  ;;  %v379_v12 = vmul.f32 %v377_v11, %v1042_v19 }
  0x9f   : > { %v392_v33 = vpop.permute.xlu1 %391  ;;  %v430_v37 = vsel %vm422_vm4, %v379_v12, %v419_v30  ;;  %v390_v38 = vpop.permute.xlu0 %389  ;;  %v429_v40 = vsel %vm422_vm4, %v378_v31, %v418_v29 }
  0xa0   : > { %v793_v41 = vpack.c.bf16 %v430_v37, %v428_v36  ;;  %v394_v43 = vsel %vm393_vm8, %v390_v38, %v392_v33  ;;  %v395_v44 = vsel %vm393_vm8, %v392_v33, %v390_v38  ;;  %v795_v45 = vpack.c.bf16 %v429_v40, %v427_v39 }
  0xa1   : > { %v397_v46 = vmul.f32 %v1055_v32, %v395_v44  ;;  %v396_v47 = vmul.f32 %v1066_v42, %v394_v43 }
  0xa2   : > { %794 = vmatprep.subr.bf16.mxu0 %v793_v41 }
  0xa3   : > { %796 = vmatpush1.bf16.msra.mxu0 %v795_v45 }
  0xa4   : > { %779 = vmatprep.subr.msk.mxu0 %vm422_vm4, %v397_v46 }
  0xa7   : > { %780 = vmatpush1.msk.msra.mxu0 %vm422_vm4, %v396_v47 }
  0xa8   : > { %781 = vmatmul.mubr.msk.f32.vlgmr.msra.gmra.mrb[0].mxu0 %vm438_vm9, %v431_v48 }
  0xb0   : > { %v436_v49 = vpop.permute.xlu0 %435 }
 0x17b   : > { %v514_v50 = vpop.f32.mrb[0].mxu0 }
 0x17c   : > { %v515_v51 = vadd.f32 %v514_v50, %v436_v49  ;;  %v516_v54 = vpop.f32.mrb[1].mxu0 }
 0x17d   : > { %v517_v56 = vadd.f32 %v516_v54, %v436_v49 }
 0x17e   : > { %v1080_v55 = vmax.f32 %v515_v51, 0.0 }
 0x17f   : > { %v1086_v57 = vmax.f32 %v517_v56, 0.0 }
 0x180   : > { %545 = vrot.lane.b32.xlu0 %v1080_v55, %s833_s27  ;;  %529 = vrot.lane.b32.xlu1 %v1080_v55, %s834_s28 }
 0x184   : > { %521 = vrot.lane.b32.xlu0 %v1080_v55, %s835_s29  ;;  %531 = vrot.lane.b32.xlu1 %v1086_v57, %s834_s28 }
 0x188   : > { %537 = vrot.lane.b32.xlu0 %v1080_v55, %s836_s30  ;;  %547 = vrot.lane.b32.xlu1 %v1086_v57, %s833_s27 }
 0x18c   : > { %553 = vrot.lane.b32.xlu0 %v1080_v55, %s837_s7  ;;  %523 = vrot.lane.b32.xlu1 %v1086_v57, %s835_s29 }
 0x190   : > { %569 = vrot.lane.b32.xlu0 %v1080_v55, %s838_s8  ;;  %539 = vrot.lane.b32.xlu1 %v1086_v57, %s836_s30 }
 0x194   : > { %561 = vrot.lane.b32.xlu0 %v1080_v55, %s840_s9  ;;  %555 = vrot.lane.b32.xlu1 %v1086_v57, %s837_s7 }
 0x198   : > { %577 = vrot.lane.b32.xlu0 %v1080_v55, %s842_s10  ;;  %571 = vrot.lane.b32.xlu1 %v1086_v57, %s838_s8  ;;  %s251_s8 = scalar_lea.vmem %s1199_s6, %s787_s23 }
 0x19c   : > { %621 = vperm.xlu0 %823, %v618_v58   ;;  %563 = vrot.lane.b32.xlu1 %v1086_v57, %s840_s9 }
 0x1a0   : > { %579 = vrot.lane.b32.xlu1 %v1086_v57, %s842_s10 }
 0x1f2   : > { %v546_v59 = vpop.permute.xlu0 %545  ;;  %v530_v60 = vpop.permute.xlu1 %529 }
 0x1f6   : > { %v522_v61 = vpop.permute.xlu0 %521  ;;  %v532_v62 = vpop.permute.xlu1 %531 }
 0x1f7   : > { %v533_v5 = vsel %vm339_vm1, %v530_v60, %v532_v62  ;;  %v534_v6 = vsel %vm339_vm1, %v532_v62, %v530_v60 }
 0x1f8   : > { %v535_v13 = vmul.f32 %v534_v6, %v966_v22  ;;  %v536_v15 = vmul.f32 %v533_v5, %v969_v23 }
 0x1fa   : > { %v538_v63 = vpop.permute.xlu0 %537  ;;  %v548_v2 = vpop.permute.xlu1 %547  ;;  %v587_v30 = vrot.slane %v535_v13, 4  ;;  %v588_v22 = vrot.slane %v536_v15, 4 }
 0x1fb   : > { %v549_v8 = vsel %vm357_vm0, %v546_v59, %v548_v2  ;;  %v550_v9 = vsel %vm357_vm0, %v548_v2, %v546_v59 }
 0x1fc   : > { %v551_v21 = vmul.f32 %v550_v9, %v954_v17  ;;  %v552_v26 = vmul.f32 %v549_v8, %v957_v18 }
 0x1fe   : > { %v524_v10 = vpop.permute.xlu1 %523  ;;  %v554_v27 = vpop.permute.xlu0 %553  ;;  %v593_v12 = vrot.slane %v551_v21, 4  ;;  %v594_v33 = vrot.slane %v552_v26, 4 }
 0x1ff   : > { %v525_v16 = vsel %vm330_vm2, %v522_v61, %v524_v10  ;;  %v526_v20 = vsel %vm330_vm2, %v524_v10, %v522_v61 }
 0x200   : > { %v527_v28 = vmul.f32 %v526_v20, %v972_v24  ;;  %v528_v11 = vmul.f32 %v525_v16, %v975_v25 }
 0x202   : > { %v540_v29 = vpop.permute.xlu1 %539  ;;  %v570_v36 = vpop.permute.xlu0 %569  ;;  %v610_v24 = vsel %vm422_vm4, %v528_v11, %v588_v22  ;;  %v609_v38 = vsel %vm422_vm4, %v527_v28, %v587_v30 }
 0x203   : > { %v541_v23 = vsel %vm348_vm3, %v538_v63, %v540_v29  ;;  %v542_v31 = vsel %vm348_vm3, %v540_v29, %v538_v63 }
 0x204   : > { %v543_v17 = vmul.f32 %v542_v31, %v988_v34  ;;  %v544_v18 = vmul.f32 %v541_v23, %v991_v35 }
 0x206   : > { %v556_v37 = vpop.permute.xlu1 %555  ;;  %v612_v25 = vsel %vm422_vm4, %v544_v18, %v594_v33  ;;  %v611_v39 = vsel %vm422_vm4, %v543_v17, %v593_v12  ;;  %v562_v48 = vpop.permute.xlu0 %561 }
 0x207   : > { %v557_v40 = vsel %vm366_vm5, %v554_v27, %v556_v37  ;;  %v558_v41 = vsel %vm366_vm5, %v556_v37, %v554_v27  ;;  %v797_v43 = vpack.c.bf16 %v612_v25, %v610_v24  ;;  %v799_v34 = vpack.c.bf16 %v611_v39, %v609_v38 }
 0x208   : > { %v559_v35 = vmul.f32 %v557_v40, %v1009_v52  ;;  %v560_v44 = vmul.f32 %v558_v41, %v1012_v53 }
 0x209   : > { %798 = vmatprep.subr.bf16.mxu1 %v797_v43 }
 0x20a   : > { %800 = vmatpush1.bf16.msra.mxu1 %v799_v34  ;;  %v572_v45 = vpop.permute.xlu1 %571  ;;  %v599_v51 = vrot.slane %v559_v35, 4  ;;  %v600_v54 = vrot.slane %v560_v44, 4  ;;  %v578_v62 = vpop.permute.xlu0 %577 }
 0x20b   : > { %v573_v46 = vsel %vm384_vm6, %v570_v36, %v572_v45  ;;  %v574_v47 = vsel %vm384_vm6, %v572_v45, %v570_v36 }
 0x20c   : > { %v575_v49 = vmul.f32 %v573_v46, %v1024_v3  ;;  %v576_v50 = vmul.f32 %v574_v47, %v1027_v4  ;;  %v614_v3 = vsel %vm422_vm4, %v1086_v57, %v600_v54  ;;  %v613_v2 = vsel %vm422_vm4, %v1080_v55, %v599_v51  ;;  %v617_v55 = vld [vmem:[%s1196_s3] sm:$0xf] }
 0x20e   : > { %v564_v56 = vpop.permute.xlu1 %563  ;;  %v605_v58 = vrot.slane %v575_v49, 4  ;;  %v606_v59 = vrot.slane %v576_v50, 4 }
 0x20f   : > { %v565_v52 = vsel %vm375_vm7, %v562_v48, %v564_v56  ;;  %v566_v53 = vsel %vm375_vm7, %v564_v56, %v562_v48 }
 0x210   : > { %v567_v60 = vmul.f32 %v565_v52, %v1037_v14  ;;  %v568_v61 = vmul.f32 %v566_v53, %v1042_v19 }
 0x212   : > { %v580_v63 = vpop.permute.xlu1 %579  ;;  %v616_v4 = vsel %vm422_vm4, %v568_v61, %v606_v59  ;;  %v615_v5 = vsel %vm422_vm4, %v567_v60, %v605_v58 }
 0x213   : > { %v582_v6 = vsel %vm393_vm8, %v580_v63, %v578_v62  ;;  %v801_v8 = vpack.c.bf16 %v616_v4, %v614_v3  ;;  %v803_v9 = vpack.c.bf16 %v615_v5, %v613_v2  ;;  %v581_v19 = vsel %vm393_vm8, %v578_v62, %v580_v63 }
 0x214   : > { %v584_v14 = vmul.f32 %v1055_v32, %v582_v6  ;;  %v583_v57 = vmul.f32 %v1066_v42, %v581_v19 }
 0x215   : > { %802 = vmatprep.subr.bf16.mxu1 %v801_v8 }
 0x216   : > { %804 = vmatpush1.bf16.msra.mxu1 %v803_v9 }
 0x217   : > { %782 = vmatprep.subr.msk.mxu1 %vm422_vm4, %v584_v14 }
 0x21a   : > { %783 = vmatpush1.msk.msra.mxu1 %vm422_vm4, %v583_v57 }
 0x21b   : > { %784 = vmatmul.mubr.msk.f32.vlgmr.msra.gmra.mrb[0].mxu1 %vm438_vm9, %v617_v55  ;;  %v622_v10 = vpop.permute.xlu0 %621 }
 0x2ee   : > { %v699_v32 = vpop.f32.mrb[0].mxu1 }
 0x2ef   : > { %v700_v13 = vadd.f32 %v699_v32, %v622_v10  ;;  %v701_v7 = vpop.f32.mrb[1].mxu1 }
 0x2f0   : > { %v702_v15 = vadd.f32 %v701_v7, %v622_v10 }
 0x2f1   : > { %v704_v16 = vadd.f32 %v700_v13, %v894_v0 }
 0x2f2   : > { %v705_v20 = vadd.f32 %v702_v15, %v902_v1 }
 0x2f3   : > { %v706_v21 = vmax.f32 %v704_v16, 0.0 }
 0x2f4   : > { %v707_v26 = vmax.f32 %v705_v20, 0.0 }
 0x2f6   : > { %v710_v42 = vcombine.low %v706_v21, %v707_v26 }
 0x2f8   : > { %712 = vst [vmem:[%s251_s8] sm:$0xff] %v710_v42 }
 0x2f9 PF: > { %s16_s21 = sadd.s32 1, %s831_s21  }
 0x2fa   : > { %p13_p4 = scmp.ge.s32.totalorder %s16_s21, 4  }
 0x2fc   :  { %15 = sbr.rel (!%p13_p4) target bundleno = 1 (0x1), region = 74 }

</bundles_post_ra>
